<compile_context>
chip_gen: v7x
topology: tpu7x:2x2x1
jax: 0.10.0
libtpu: 0.0.40
codegen_flags: <defaults>
</compile_context>

<pallas_src>
import functools

import jax
import jax.numpy as jnp
from jax import lax
from jax.experimental import pallas as pl
from jax.experimental.pallas import tpu as pltpu


def _attention_kernel(x_ref, wqkv_ref, wo_ref, bias_ref, o_ref, ctx_ref,
                      *, num_heads):
    """One grid step = one batch element.

    x_ref   : (N, C)   bf16  (batch dim squeezed by BlockSpec)
    wqkv_ref: (C, 3C)  bf16  resident; columns = [Q heads | K heads | V heads]
                             head-major; qk scale folded into the Q columns.
    wo_ref  : (C, C)   bf16  resident (Wproj^T, rows head-major).
    bias_ref: (1, C)   f32   resident.
    o_ref   : (N, C)   output dtype.
    ctx_ref : (N, C)   bf16  VMEM scratch (head-major context channels).
    """
    N, C = x_ref.shape
    head_dim = C // num_heads

    x = x_ref[...]                                                # (N, C) bf16

    # Fused QKV projection for all heads: one full-width MXU matmul
    # (contraction depth C, output width 3C), f32 accumulation, one cast.
    qkv = jnp.dot(x, wqkv_ref[...],
                  preferred_element_type=jnp.float32)             # (N, 3C) f32
    qkv = qkv.astype(jnp.bfloat16)

    # Per-head scores + context (statically unrolled; all slices static).
    for h in range(num_heads):
        lo = h * head_dim
        q_h = qkv[:, lo:lo + head_dim]                            # (N, Dh)
        k_h = qkv[:, C + lo:C + lo + head_dim]                    # (N, Dh)
        v_h = qkv[:, 2 * C + lo:2 * C + lo + head_dim]            # (N, Dh)

        # Scores: q_h @ k_h^T, bf16 operands, f32 accumulation.
        s = lax.dot_general(q_h, k_h, (((1,), (1,)), ((), ())),
                            preferred_element_type=jnp.float32)   # (N, N) f32

        # Numerically stable softmax with deferred normalization: normalize
        # the (N, Dh) context instead of the (N, N) probability tile.
        s = s - jnp.max(s, axis=-1, keepdims=True)
        p = jnp.exp(s)
        denom = jnp.sum(p, axis=-1, keepdims=True)                # (N, 1)

        ctx = jnp.dot(p.astype(jnp.bfloat16), v_h,
                      preferred_element_type=jnp.float32)         # (N, Dh) f32
        ctx = ctx * pl.reciprocal(denom, approx=True)
        ctx_ref[:, lo:lo + head_dim] = ctx.astype(jnp.bfloat16)

    # Single full-width output projection (contraction depth C) + bias.
    out = jnp.dot(ctx_ref[...], wo_ref[...],
                  preferred_element_type=jnp.float32)             # (N, C) f32
    o_ref[...] = (out + bias_ref[...]).astype(o_ref.dtype)


def attention_forward(x, wqkv, wproj, bproj, *, num_heads, qk_scale=None):
    """x: (B, N, C);  wqkv: (3C, C);  wproj: (C, C);  bproj: (C,)."""
    B, N, C = x.shape
    assert C % num_heads == 0
    head_dim = C // num_heads
    scale = qk_scale if qk_scale is not None else head_dim ** (-0.5)

    # nn.Linear computes x @ W^T.  The 3C qkv output features are already
    # ordered (3, H, Dh) = [Q heads | K heads | V heads] head-major, so W^T's
    # columns need no re-layout.  Fold the qk scale into the Q columns.
    wqkv_t = wqkv.T.astype(jnp.float32)                           # (C, 3C)
    wqkv_t = wqkv_t.at[:, :C].multiply(scale)
    wo_t = wproj.T.astype(jnp.float32)                            # (C, C)
    bias = bproj.astype(jnp.float32).reshape(1, C)

    x_bf = x.astype(jnp.bfloat16)
    wqkv_bf = wqkv_t.astype(jnp.bfloat16)
    wo_bf = wo_t.astype(jnp.bfloat16)

    kernel = functools.partial(_attention_kernel, num_heads=num_heads)
    sq = pl.Squeezed()

    return pl.pallas_call(
        kernel,
        out_shape=jax.ShapeDtypeStruct((B, N, C), x.dtype),
        grid=(B,),
        in_specs=[
            pl.BlockSpec((sq, N, C), lambda b: (b, 0, 0)),        # x[b]
            pl.BlockSpec((C, 3 * C), lambda b: (0, 0)),           # Wqkv^T (resident)
            pl.BlockSpec((C, C), lambda b: (0, 0)),               # Wproj^T (resident)
            pl.BlockSpec((1, C), lambda b: (0, 0)),               # bias   (resident)
        ],
        out_specs=pl.BlockSpec((sq, N, C), lambda b: (b, 0, 0)),
        scratch_shapes=[pltpu.VMEM((N, C), jnp.bfloat16)],
        compiler_params=pltpu.CompilerParams(
            dimension_semantics=("parallel",)),
    )(x_bf, wqkv_bf, wo_bf, bias)


def attention_reference(x, wqkv, wproj, bproj, *, num_heads, qk_scale=None):
    """Pure-JAX f32 reference mirroring the PyTorch module exactly."""
    B, N, C = x.shape
    head_dim = C // num_heads
    scale = qk_scale if qk_scale is not None else head_dim ** (-0.5)

    qkv = x @ wqkv.T                                              # (B, N, 3C)
    qkv = qkv.reshape(B, N, 3, num_heads, head_dim)
    qkv = jnp.transpose(qkv, (2, 0, 3, 1, 4))                     # (3, B, H, N, Dh)
    q, k, v = qkv[0], qkv[1], qkv[2]
    q = q * scale
    attn = jnp.einsum("bhnd,bhmd->bhnm", q, k)
    attn = jax.nn.softmax(attn, axis=-1)
    out = jnp.einsum("bhnm,bhmd->bhnd", attn, v)
    out = jnp.transpose(out, (0, 2, 1, 3)).reshape(B, N, C)
    return out @ wproj.T + bproj


if __name__ == "__main__":
    # Small shapes consistent with the module: B=2, N=8 tokens, C=32 dims,
    # num_heads=8 -> head_dim=4.
    B, N, C = 2, 8, 32
    num_heads = 8

    key = jax.random.PRNGKey(0)
    kx, kqkv, kproj, kb = jax.random.split(key, 4)

    x = jax.random.normal(kx, (B, N, C), dtype=jnp.float32)
    wqkv = jax.random.normal(kqkv, (3 * C, C), dtype=jnp.float32) * (C ** -0.5)
    wproj = jax.random.normal(kproj, (C, C), dtype=jnp.float32) * (C ** -0.5)
    bproj = jax.random.normal(kb, (C,), dtype=jnp.float32) * 0.01

    out = attention_forward(x, wqkv, wproj, bproj, num_heads=num_heads)
    out = jax.block_until_ready(out)

    ref = attention_reference(x, wqkv, wproj, bproj, num_heads=num_heads)
    assert out.shape == (B, N, C)
    max_err = float(jnp.max(jnp.abs(out - ref)))
    # bf16 MXU operands (f32 accumulation) + approx reciprocal vs. f32 ref.
    assert max_err < 5e-2, f"max abs err {max_err}"

    print("KERNEL_OK")
</pallas_src>

<mosaic_0001>
module attributes {stable_mosaic.version = 11 : i64} {
  func.func @_attention_kernel(%arg0: i32, %arg1: memref<1x8x32xbf16, #tpu.memory_space<vmem>>, %arg2: memref<32x96xbf16, #tpu.memory_space<vmem>>, %arg3: memref<32x32xbf16, #tpu.memory_space<vmem>>, %arg4: memref<1x32xf32, #tpu.memory_space<vmem>>, %arg5: memref<1x8x32xf32, #tpu.memory_space<vmem>>, %arg6: memref<8x32xbf16, #tpu.memory_space<vmem>>) attributes {dimension_semantics = [#tpu.dimension_semantics<parallel>], iteration_bounds = array<i64: 2>, scalar_prefetch = 0 : i64, scratch_operands = 1 : i64, tpu.core_type = #tpu.core_type<tc>, window_params = [{transform_indices = @transform_0, window_bounds = array<i64: 1, 8, 32>}, {pipeline_mode = #tpu.pipeline_mode<synchronous>, transform_indices = @transform_1, window_bounds = array<i64: 32, 96>}, {pipeline_mode = #tpu.pipeline_mode<synchronous>, transform_indices = @transform_2, window_bounds = array<i64: 32, 32>}, {pipeline_mode = #tpu.pipeline_mode<synchronous>, transform_indices = @transform_3, window_bounds = array<i64: 1, 32>}, {transform_indices = @transform_4, window_bounds = array<i64: 1, 8, 32>}]} {
    %c0 = arith.constant 0 : index
    %c0_0 = arith.constant 0 : index
    %c0_1 = arith.constant 0 : index
    %0 = vector.load %arg1[%c0, %c0_0, %c0_1] : memref<1x8x32xbf16, #tpu.memory_space<vmem>>, vector<1x8x32xbf16>
    %1 = vector.shape_cast %0 : vector<1x8x32xbf16> to vector<8x32xbf16>
    %c0_2 = arith.constant 0 : index
    %c0_3 = arith.constant 0 : index
    %2 = vector.load %arg2[%c0_2, %c0_3] : memref<32x96xbf16, #tpu.memory_space<vmem>>, vector<32x96xbf16>
    %cst = arith.constant dense<0.000000e+00> : vector<8x96xf32>
    %3 = tpu.matmul %1, %2, %cst {dimension_numbers = #tpu.dot_dimension_numbers<[1], [0], [0], [1], [0, 0, 1, 1], [], []>} : vector<8x32xbf16>, vector<32x96xbf16>, vector<8x96xf32> -> vector<8x96xf32>
    %4 = arith.truncf %3 : vector<8x96xf32> to vector<8x96xbf16>
    %5 = vector.extract_strided_slice %4 {offsets = [0, 0], sizes = [8, 4], strides = [1, 1]} : vector<8x96xbf16> to vector<8x4xbf16>
    %6 = vector.extract_strided_slice %4 {offsets = [0, 32], sizes = [8, 4], strides = [1, 1]} : vector<8x96xbf16> to vector<8x4xbf16>
    %7 = vector.extract_strided_slice %4 {offsets = [0, 64], sizes = [8, 4], strides = [1, 1]} : vector<8x96xbf16> to vector<8x4xbf16>
    %cst_4 = arith.constant dense<0.000000e+00> : vector<8x8xf32>
    %8 = tpu.matmul %5, %6, %cst_4 {dimension_numbers = #tpu.dot_dimension_numbers<[1], [1], [0], [0], [0, 0, 1, 0], [], []>} : vector<8x4xbf16>, vector<8x4xbf16>, vector<8x8xf32> -> vector<8x8xf32>
    %cst_5 = arith.constant dense<0xFF800000> : vector<8xf32>
    %9 = vector.multi_reduction <maximumf>, %8, %cst_5 [1] : vector<8x8xf32> to vector<8xf32>
    %10 = vector.shape_cast %9 : vector<8xf32> to vector<8x1xf32>
    %11 = vector.broadcast %10 : vector<8x1xf32> to vector<8x8xf32>
    %12 = arith.subf %8, %11 : vector<8x8xf32>
    %13 = math.exp %12 : vector<8x8xf32>
    %cst_6 = arith.constant dense<0.000000e+00> : vector<8xf32>
    %14 = vector.multi_reduction <add>, %13, %cst_6 [1] : vector<8x8xf32> to vector<8xf32>
    %15 = vector.shape_cast %14 : vector<8xf32> to vector<8x1xf32>
    %16 = arith.truncf %13 : vector<8x8xf32> to vector<8x8xbf16>
    %cst_7 = arith.constant dense<0.000000e+00> : vector<8x4xf32>
    %17 = tpu.matmul %16, %7, %cst_7 {dimension_numbers = #tpu.dot_dimension_numbers<[1], [0], [0], [1], [0, 0, 1, 1], [], []>} : vector<8x8xbf16>, vector<8x4xbf16>, vector<8x4xf32> -> vector<8x4xf32>
    %18 = tpu.reciprocal %15 {approx = true} : vector<8x1xf32> -> vector<8x1xf32>
    %19 = vector.broadcast %18 : vector<8x1xf32> to vector<8x4xf32>
    %20 = arith.mulf %17, %19 : vector<8x4xf32>
    %21 = arith.truncf %20 : vector<8x4xf32> to vector<8x4xbf16>
    %c0_8 = arith.constant 0 : index
    %c0_9 = arith.constant 0 : index
    %22 = vector.load %arg6[%c0_8, %c0_9] : memref<8x32xbf16, #tpu.memory_space<vmem>>, vector<8x4xbf16>
    tpu.vector_store %arg6[%c0_8, %c0_9], %21 {strides = array<i32>} : memref<8x32xbf16, #tpu.memory_space<vmem>>, vector<8x4xbf16>,
    %23 = vector.extract_strided_slice %4 {offsets = [0, 4], sizes = [8, 4], strides = [1, 1]} : vector<8x96xbf16> to vector<8x4xbf16>
    %24 = vector.extract_strided_slice %4 {offsets = [0, 36], sizes = [8, 4], strides = [1, 1]} : vector<8x96xbf16> to vector<8x4xbf16>
    %25 = vector.extract_strided_slice %4 {offsets = [0, 68], sizes = [8, 4], strides = [1, 1]} : vector<8x96xbf16> to vector<8x4xbf16>
    %cst_10 = arith.constant dense<0.000000e+00> : vector<8x8xf32>
    %26 = tpu.matmul %23, %24, %cst_10 {dimension_numbers = #tpu.dot_dimension_numbers<[1], [1], [0], [0], [0, 0, 1, 0], [], []>} : vector<8x4xbf16>, vector<8x4xbf16>, vector<8x8xf32> -> vector<8x8xf32>
    %cst_11 = arith.constant dense<0xFF800000> : vector<8xf32>
    %27 = vector.multi_reduction <maximumf>, %26, %cst_11 [1] : vector<8x8xf32> to vector<8xf32>
    %28 = vector.shape_cast %27 : vector<8xf32> to vector<8x1xf32>
    %29 = vector.broadcast %28 : vector<8x1xf32> to vector<8x8xf32>
    %30 = arith.subf %26, %29 : vector<8x8xf32>
    %31 = math.exp %30 : vector<8x8xf32>
    %cst_12 = arith.constant dense<0.000000e+00> : vector<8xf32>
    %32 = vector.multi_reduction <add>, %31, %cst_12 [1] : vector<8x8xf32> to vector<8xf32>
    %33 = vector.shape_cast %32 : vector<8xf32> to vector<8x1xf32>
    %34 = arith.truncf %31 : vector<8x8xf32> to vector<8x8xbf16>
    %cst_13 = arith.constant dense<0.000000e+00> : vector<8x4xf32>
    %35 = tpu.matmul %34, %25, %cst_13 {dimension_numbers = #tpu.dot_dimension_numbers<[1], [0], [0], [1], [0, 0, 1, 1], [], []>} : vector<8x8xbf16>, vector<8x4xbf16>, vector<8x4xf32> -> vector<8x4xf32>
    %36 = tpu.reciprocal %33 {approx = true} : vector<8x1xf32> -> vector<8x1xf32>
    %37 = vector.broadcast %36 : vector<8x1xf32> to vector<8x4xf32>
    %38 = arith.mulf %35, %37 : vector<8x4xf32>
    %39 = arith.truncf %38 : vector<8x4xf32> to vector<8x4xbf16>
    %c0_14 = arith.constant 0 : index
    %c4 = arith.constant 4 : index
    %40 = vector.load %arg6[%c0_14, %c4] : memref<8x32xbf16, #tpu.memory_space<vmem>>, vector<8x4xbf16>
    tpu.vector_store %arg6[%c0_14, %c4], %39 {strides = array<i32>} : memref<8x32xbf16, #tpu.memory_space<vmem>>, vector<8x4xbf16>,
    %41 = vector.extract_strided_slice %4 {offsets = [0, 8], sizes = [8, 4], strides = [1, 1]} : vector<8x96xbf16> to vector<8x4xbf16>
    %42 = vector.extract_strided_slice %4 {offsets = [0, 40], sizes = [8, 4], strides = [1, 1]} : vector<8x96xbf16> to vector<8x4xbf16>
    %43 = vector.extract_strided_slice %4 {offsets = [0, 72], sizes = [8, 4], strides = [1, 1]} : vector<8x96xbf16> to vector<8x4xbf16>
    %cst_15 = arith.constant dense<0.000000e+00> : vector<8x8xf32>
    %44 = tpu.matmul %41, %42, %cst_15 {dimension_numbers = #tpu.dot_dimension_numbers<[1], [1], [0], [0], [0, 0, 1, 0], [], []>} : vector<8x4xbf16>, vector<8x4xbf16>, vector<8x8xf32> -> vector<8x8xf32>
    %cst_16 = arith.constant dense<0xFF800000> : vector<8xf32>
    %45 = vector.multi_reduction <maximumf>, %44, %cst_16 [1] : vector<8x8xf32> to vector<8xf32>
    %46 = vector.shape_cast %45 : vector<8xf32> to vector<8x1xf32>
    %47 = vector.broadcast %46 : vector<8x1xf32> to vector<8x8xf32>
    %48 = arith.subf %44, %47 : vector<8x8xf32>
    %49 = math.exp %48 : vector<8x8xf32>
    %cst_17 = arith.constant dense<0.000000e+00> : vector<8xf32>
    %50 = vector.multi_reduction <add>, %49, %cst_17 [1] : vector<8x8xf32> to vector<8xf32>
    %51 = vector.shape_cast %50 : vector<8xf32> to vector<8x1xf32>
    %52 = arith.truncf %49 : vector<8x8xf32> to vector<8x8xbf16>
    %cst_18 = arith.constant dense<0.000000e+00> : vector<8x4xf32>
    %53 = tpu.matmul %52, %43, %cst_18 {dimension_numbers = #tpu.dot_dimension_numbers<[1], [0], [0], [1], [0, 0, 1, 1], [], []>} : vector<8x8xbf16>, vector<8x4xbf16>, vector<8x4xf32> -> vector<8x4xf32>
    %54 = tpu.reciprocal %51 {approx = true} : vector<8x1xf32> -> vector<8x1xf32>
    %55 = vector.broadcast %54 : vector<8x1xf32> to vector<8x4xf32>
    %56 = arith.mulf %53, %55 : vector<8x4xf32>
    %57 = arith.truncf %56 : vector<8x4xf32> to vector<8x4xbf16>
    %c0_19 = arith.constant 0 : index
    %c8 = arith.constant 8 : index
    %58 = vector.load %arg6[%c0_19, %c8] : memref<8x32xbf16, #tpu.memory_space<vmem>>, vector<8x4xbf16>
    tpu.vector_store %arg6[%c0_19, %c8], %57 {strides = array<i32>} : memref<8x32xbf16, #tpu.memory_space<vmem>>, vector<8x4xbf16>,
    %59 = vector.extract_strided_slice %4 {offsets = [0, 12], sizes = [8, 4], strides = [1, 1]} : vector<8x96xbf16> to vector<8x4xbf16>
    %60 = vector.extract_strided_slice %4 {offsets = [0, 44], sizes = [8, 4], strides = [1, 1]} : vector<8x96xbf16> to vector<8x4xbf16>
    %61 = vector.extract_strided_slice %4 {offsets = [0, 76], sizes = [8, 4], strides = [1, 1]} : vector<8x96xbf16> to vector<8x4xbf16>
    %cst_20 = arith.constant dense<0.000000e+00> : vector<8x8xf32>
    %62 = tpu.matmul %59, %60, %cst_20 {dimension_numbers = #tpu.dot_dimension_numbers<[1], [1], [0], [0], [0, 0, 1, 0], [], []>} : vector<8x4xbf16>, vector<8x4xbf16>, vector<8x8xf32> -> vector<8x8xf32>
    %cst_21 = arith.constant dense<0xFF800000> : vector<8xf32>
    %63 = vector.multi_reduction <maximumf>, %62, %cst_21 [1] : vector<8x8xf32> to vector<8xf32>
    %64 = vector.shape_cast %63 : vector<8xf32> to vector<8x1xf32>
    %65 = vector.broadcast %64 : vector<8x1xf32> to vector<8x8xf32>
    %66 = arith.subf %62, %65 : vector<8x8xf32>
    %67 = math.exp %66 : vector<8x8xf32>
    %cst_22 = arith.constant dense<0.000000e+00> : vector<8xf32>
    %68 = vector.multi_reduction <add>, %67, %cst_22 [1] : vector<8x8xf32> to vector<8xf32>
    %69 = vector.shape_cast %68 : vector<8xf32> to vector<8x1xf32>
    %70 = arith.truncf %67 : vector<8x8xf32> to vector<8x8xbf16>
    %cst_23 = arith.constant dense<0.000000e+00> : vector<8x4xf32>
    %71 = tpu.matmul %70, %61, %cst_23 {dimension_numbers = #tpu.dot_dimension_numbers<[1], [0], [0], [1], [0, 0, 1, 1], [], []>} : vector<8x8xbf16>, vector<8x4xbf16>, vector<8x4xf32> -> vector<8x4xf32>
    %72 = tpu.reciprocal %69 {approx = true} : vector<8x1xf32> -> vector<8x1xf32>
    %73 = vector.broadcast %72 : vector<8x1xf32> to vector<8x4xf32>
    %74 = arith.mulf %71, %73 : vector<8x4xf32>
    %75 = arith.truncf %74 : vector<8x4xf32> to vector<8x4xbf16>
    %c0_24 = arith.constant 0 : index
    %c12 = arith.constant 12 : index
    %76 = vector.load %arg6[%c0_24, %c12] : memref<8x32xbf16, #tpu.memory_space<vmem>>, vector<8x4xbf16>
    tpu.vector_store %arg6[%c0_24, %c12], %75 {strides = array<i32>} : memref<8x32xbf16, #tpu.memory_space<vmem>>, vector<8x4xbf16>,
    %77 = vector.extract_strided_slice %4 {offsets = [0, 16], sizes = [8, 4], strides = [1, 1]} : vector<8x96xbf16> to vector<8x4xbf16>
    %78 = vector.extract_strided_slice %4 {offsets = [0, 48], sizes = [8, 4], strides = [1, 1]} : vector<8x96xbf16> to vector<8x4xbf16>
    %79 = vector.extract_strided_slice %4 {offsets = [0, 80], sizes = [8, 4], strides = [1, 1]} : vector<8x96xbf16> to vector<8x4xbf16>
    %cst_25 = arith.constant dense<0.000000e+00> : vector<8x8xf32>
    %80 = tpu.matmul %77, %78, %cst_25 {dimension_numbers = #tpu.dot_dimension_numbers<[1], [1], [0], [0], [0, 0, 1, 0], [], []>} : vector<8x4xbf16>, vector<8x4xbf16>, vector<8x8xf32> -> vector<8x8xf32>
    %cst_26 = arith.constant dense<0xFF800000> : vector<8xf32>
    %81 = vector.multi_reduction <maximumf>, %80, %cst_26 [1] : vector<8x8xf32> to vector<8xf32>
    %82 = vector.shape_cast %81 : vector<8xf32> to vector<8x1xf32>
    %83 = vector.broadcast %82 : vector<8x1xf32> to vector<8x8xf32>
    %84 = arith.subf %80, %83 : vector<8x8xf32>
    %85 = math.exp %84 : vector<8x8xf32>
    %cst_27 = arith.constant dense<0.000000e+00> : vector<8xf32>
    %86 = vector.multi_reduction <add>, %85, %cst_27 [1] : vector<8x8xf32> to vector<8xf32>
    %87 = vector.shape_cast %86 : vector<8xf32> to vector<8x1xf32>
    %88 = arith.truncf %85 : vector<8x8xf32> to vector<8x8xbf16>
    %cst_28 = arith.constant dense<0.000000e+00> : vector<8x4xf32>
    %89 = tpu.matmul %88, %79, %cst_28 {dimension_numbers = #tpu.dot_dimension_numbers<[1], [0], [0], [1], [0, 0, 1, 1], [], []>} : vector<8x8xbf16>, vector<8x4xbf16>, vector<8x4xf32> -> vector<8x4xf32>
    %90 = tpu.reciprocal %87 {approx = true} : vector<8x1xf32> -> vector<8x1xf32>
    %91 = vector.broadcast %90 : vector<8x1xf32> to vector<8x4xf32>
    %92 = arith.mulf %89, %91 : vector<8x4xf32>
    %93 = arith.truncf %92 : vector<8x4xf32> to vector<8x4xbf16>
    %c0_29 = arith.constant 0 : index
    %c16 = arith.constant 16 : index
    %94 = vector.load %arg6[%c0_29, %c16] : memref<8x32xbf16, #tpu.memory_space<vmem>>, vector<8x4xbf16>
    tpu.vector_store %arg6[%c0_29, %c16], %93 {strides = array<i32>} : memref<8x32xbf16, #tpu.memory_space<vmem>>, vector<8x4xbf16>,
    %95 = vector.extract_strided_slice %4 {offsets = [0, 20], sizes = [8, 4], strides = [1, 1]} : vector<8x96xbf16> to vector<8x4xbf16>
    %96 = vector.extract_strided_slice %4 {offsets = [0, 52], sizes = [8, 4], strides = [1, 1]} : vector<8x96xbf16> to vector<8x4xbf16>
    %97 = vector.extract_strided_slice %4 {offsets = [0, 84], sizes = [8, 4], strides = [1, 1]} : vector<8x96xbf16> to vector<8x4xbf16>
    %cst_30 = arith.constant dense<0.000000e+00> : vector<8x8xf32>
    %98 = tpu.matmul %95, %96, %cst_30 {dimension_numbers = #tpu.dot_dimension_numbers<[1], [1], [0], [0], [0, 0, 1, 0], [], []>} : vector<8x4xbf16>, vector<8x4xbf16>, vector<8x8xf32> -> vector<8x8xf32>
    %cst_31 = arith.constant dense<0xFF800000> : vector<8xf32>
    %99 = vector.multi_reduction <maximumf>, %98, %cst_31 [1] : vector<8x8xf32> to vector<8xf32>
    %100 = vector.shape_cast %99 : vector<8xf32> to vector<8x1xf32>
    %101 = vector.broadcast %100 : vector<8x1xf32> to vector<8x8xf32>
    %102 = arith.subf %98, %101 : vector<8x8xf32>
    %103 = math.exp %102 : vector<8x8xf32>
    %cst_32 = arith.constant dense<0.000000e+00> : vector<8xf32>
    %104 = vector.multi_reduction <add>, %103, %cst_32 [1] : vector<8x8xf32> to vector<8xf32>
    %105 = vector.shape_cast %104 : vector<8xf32> to vector<8x1xf32>
    %106 = arith.truncf %103 : vector<8x8xf32> to vector<8x8xbf16>
    %cst_33 = arith.constant dense<0.000000e+00> : vector<8x4xf32>
    %107 = tpu.matmul %106, %97, %cst_33 {dimension_numbers = #tpu.dot_dimension_numbers<[1], [0], [0], [1], [0, 0, 1, 1], [], []>} : vector<8x8xbf16>, vector<8x4xbf16>, vector<8x4xf32> -> vector<8x4xf32>
    %108 = tpu.reciprocal %105 {approx = true} : vector<8x1xf32> -> vector<8x1xf32>
    %109 = vector.broadcast %108 : vector<8x1xf32> to vector<8x4xf32>
    %110 = arith.mulf %107, %109 : vector<8x4xf32>
    %111 = arith.truncf %110 : vector<8x4xf32> to vector<8x4xbf16>
    %c0_34 = arith.constant 0 : index
    %c20 = arith.constant 20 : index
    %112 = vector.load %arg6[%c0_34, %c20] : memref<8x32xbf16, #tpu.memory_space<vmem>>, vector<8x4xbf16>
    tpu.vector_store %arg6[%c0_34, %c20], %111 {strides = array<i32>} : memref<8x32xbf16, #tpu.memory_space<vmem>>, vector<8x4xbf16>,
    %113 = vector.extract_strided_slice %4 {offsets = [0, 24], sizes = [8, 4], strides = [1, 1]} : vector<8x96xbf16> to vector<8x4xbf16>
    %114 = vector.extract_strided_slice %4 {offsets = [0, 56], sizes = [8, 4], strides = [1, 1]} : vector<8x96xbf16> to vector<8x4xbf16>
    %115 = vector.extract_strided_slice %4 {offsets = [0, 88], sizes = [8, 4], strides = [1, 1]} : vector<8x96xbf16> to vector<8x4xbf16>
    %cst_35 = arith.constant dense<0.000000e+00> : vector<8x8xf32>
    %116 = tpu.matmul %113, %114, %cst_35 {dimension_numbers = #tpu.dot_dimension_numbers<[1], [1], [0], [0], [0, 0, 1, 0], [], []>} : vector<8x4xbf16>, vector<8x4xbf16>, vector<8x8xf32> -> vector<8x8xf32>
    %cst_36 = arith.constant dense<0xFF800000> : vector<8xf32>
    %117 = vector.multi_reduction <maximumf>, %116, %cst_36 [1] : vector<8x8xf32> to vector<8xf32>
    %118 = vector.shape_cast %117 : vector<8xf32> to vector<8x1xf32>
    %119 = vector.broadcast %118 : vector<8x1xf32> to vector<8x8xf32>
    %120 = arith.subf %116, %119 : vector<8x8xf32>
    %121 = math.exp %120 : vector<8x8xf32>
    %cst_37 = arith.constant dense<0.000000e+00> : vector<8xf32>
    %122 = vector.multi_reduction <add>, %121, %cst_37 [1] : vector<8x8xf32> to vector<8xf32>
    %123 = vector.shape_cast %122 : vector<8xf32> to vector<8x1xf32>
    %124 = arith.truncf %121 : vector<8x8xf32> to vector<8x8xbf16>
    %cst_38 = arith.constant dense<0.000000e+00> : vector<8x4xf32>
    %125 = tpu.matmul %124, %115, %cst_38 {dimension_numbers = #tpu.dot_dimension_numbers<[1], [0], [0], [1], [0, 0, 1, 1], [], []>} : vector<8x8xbf16>, vector<8x4xbf16>, vector<8x4xf32> -> vector<8x4xf32>
    %126 = tpu.reciprocal %123 {approx = true} : vector<8x1xf32> -> vector<8x1xf32>
    %127 = vector.broadcast %126 : vector<8x1xf32> to vector<8x4xf32>
    %128 = arith.mulf %125, %127 : vector<8x4xf32>
    %129 = arith.truncf %128 : vector<8x4xf32> to vector<8x4xbf16>
    %c0_39 = arith.constant 0 : index
    %c24 = arith.constant 24 : index
    %130 = vector.load %arg6[%c0_39, %c24] : memref<8x32xbf16, #tpu.memory_space<vmem>>, vector<8x4xbf16>
    tpu.vector_store %arg6[%c0_39, %c24], %129 {strides = array<i32>} : memref<8x32xbf16, #tpu.memory_space<vmem>>, vector<8x4xbf16>,
    %131 = vector.extract_strided_slice %4 {offsets = [0, 28], sizes = [8, 4], strides = [1, 1]} : vector<8x96xbf16> to vector<8x4xbf16>
    %132 = vector.extract_strided_slice %4 {offsets = [0, 60], sizes = [8, 4], strides = [1, 1]} : vector<8x96xbf16> to vector<8x4xbf16>
    %133 = vector.extract_strided_slice %4 {offsets = [0, 92], sizes = [8, 4], strides = [1, 1]} : vector<8x96xbf16> to vector<8x4xbf16>
    %cst_40 = arith.constant dense<0.000000e+00> : vector<8x8xf32>
    %134 = tpu.matmul %131, %132, %cst_40 {dimension_numbers = #tpu.dot_dimension_numbers<[1], [1], [0], [0], [0, 0, 1, 0], [], []>} : vector<8x4xbf16>, vector<8x4xbf16>, vector<8x8xf32> -> vector<8x8xf32>
    %cst_41 = arith.constant dense<0xFF800000> : vector<8xf32>
    %135 = vector.multi_reduction <maximumf>, %134, %cst_41 [1] : vector<8x8xf32> to vector<8xf32>
    %136 = vector.shape_cast %135 : vector<8xf32> to vector<8x1xf32>
    %137 = vector.broadcast %136 : vector<8x1xf32> to vector<8x8xf32>
    %138 = arith.subf %134, %137 : vector<8x8xf32>
    %139 = math.exp %138 : vector<8x8xf32>
    %cst_42 = arith.constant dense<0.000000e+00> : vector<8xf32>
    %140 = vector.multi_reduction <add>, %139, %cst_42 [1] : vector<8x8xf32> to vector<8xf32>
    %141 = vector.shape_cast %140 : vector<8xf32> to vector<8x1xf32>
    %142 = arith.truncf %139 : vector<8x8xf32> to vector<8x8xbf16>
    %cst_43 = arith.constant dense<0.000000e+00> : vector<8x4xf32>
    %143 = tpu.matmul %142, %133, %cst_43 {dimension_numbers = #tpu.dot_dimension_numbers<[1], [0], [0], [1], [0, 0, 1, 1], [], []>} : vector<8x8xbf16>, vector<8x4xbf16>, vector<8x4xf32> -> vector<8x4xf32>
    %144 = tpu.reciprocal %141 {approx = true} : vector<8x1xf32> -> vector<8x1xf32>
    %145 = vector.broadcast %144 : vector<8x1xf32> to vector<8x4xf32>
    %146 = arith.mulf %143, %145 : vector<8x4xf32>
    %147 = arith.truncf %146 : vector<8x4xf32> to vector<8x4xbf16>
    %c0_44 = arith.constant 0 : index
    %c28 = arith.constant 28 : index
    %148 = vector.load %arg6[%c0_44, %c28] : memref<8x32xbf16, #tpu.memory_space<vmem>>, vector<8x4xbf16>
    tpu.vector_store %arg6[%c0_44, %c28], %147 {strides = array<i32>} : memref<8x32xbf16, #tpu.memory_space<vmem>>, vector<8x4xbf16>,
    %c0_45 = arith.constant 0 : index
    %c0_46 = arith.constant 0 : index
    %149 = vector.load %arg6[%c0_45, %c0_46] : memref<8x32xbf16, #tpu.memory_space<vmem>>, vector<8x32xbf16>
    %c0_47 = arith.constant 0 : index
    %c0_48 = arith.constant 0 : index
    %150 = vector.load %arg3[%c0_47, %c0_48] : memref<32x32xbf16, #tpu.memory_space<vmem>>, vector<32x32xbf16>
    %cst_49 = arith.constant dense<0.000000e+00> : vector<8x32xf32>
    %151 = tpu.matmul %149, %150, %cst_49 {dimension_numbers = #tpu.dot_dimension_numbers<[1], [0], [0], [1], [0, 0, 1, 1], [], []>} : vector<8x32xbf16>, vector<32x32xbf16>, vector<8x32xf32> -> vector<8x32xf32>
    %c0_50 = arith.constant 0 : index
    %c0_51 = arith.constant 0 : index
    %152 = vector.load %arg4[%c0_50, %c0_51] : memref<1x32xf32, #tpu.memory_space<vmem>>, vector<1x32xf32>
    %153 = vector.broadcast %152 : vector<1x32xf32> to vector<8x32xf32>
    %154 = arith.addf %151, %153 : vector<8x32xf32>
    %c0_52 = arith.constant 0 : index
    %c0_53 = arith.constant 0 : index
    %c0_54 = arith.constant 0 : index
    %155 = vector.load %arg5[%c0_52, %c0_53, %c0_54] : memref<1x8x32xf32, #tpu.memory_space<vmem>>, vector<1x8x32xf32>
    %156 = vector.shape_cast %155 : vector<1x8x32xf32> to vector<8x32xf32>
    %157 = vector.shape_cast %154 : vector<8x32xf32> to vector<1x8x32xf32>
    tpu.vector_store %arg5[%c0_52, %c0_53, %c0_54], %157 {strides = array<i32>} : memref<1x8x32xf32, #tpu.memory_space<vmem>>, vector<1x8x32xf32>,
    return
  }
  func.func @transform_0(%arg0: i32) -> (i32, i32, i32) {
    %c0_i32 = arith.constant 0 : i32
    %c0_i32_0 = arith.constant 0 : i32
    %c0_i32_1 = arith.constant 0 : i32
    return %arg0, %c0_i32, %c0_i32_0 : i32, i32, i32
  }
  func.func @transform_1(%arg0: i32) -> (i32, i32) {
    %c0_i32 = arith.constant 0 : i32
    %c0_i32_0 = arith.constant 0 : i32
    %c0_i32_1 = arith.constant 0 : i32
    return %c0_i32, %c0_i32_0 : i32, i32
  }
  func.func @transform_2(%arg0: i32) -> (i32, i32) {
    %c0_i32 = arith.constant 0 : i32
    %c0_i32_0 = arith.constant 0 : i32
    %c0_i32_1 = arith.constant 0 : i32
    return %c0_i32, %c0_i32_0 : i32, i32
  }
  func.func @transform_3(%arg0: i32) -> (i32, i32) {
    %c0_i32 = arith.constant 0 : i32
    %c0_i32_0 = arith.constant 0 : i32
    %c0_i32_1 = arith.constant 0 : i32
    return %c0_i32, %c0_i32_0 : i32, i32
  }
  func.func @transform_4(%arg0: i32) -> (i32, i32, i32) {
    %c0_i32 = arith.constant 0 : i32
    %c0_i32_0 = arith.constant 0 : i32
    %c0_i32_1 = arith.constant 0 : i32
    return %arg0, %c0_i32, %c0_i32_0 : i32, i32, i32
  }
}

</mosaic_0001>

<bundles_post_ra>
// kernel: tpu_custom_call.1
= control target key start
LH: loop header
LB: loop body
LE: loop exit
PB: predicated region body
PF: predicated region fallthrough
CT: control target
= control target key end

     0   :  { %9 = vsyncpa [#allocation4], 0  ;;  %s2384_s0 = inlined_call_operand.hbm [shape: bf16[2,8,32], index: 0, kind: input, shape index: {}]   ;;  %s2385_s1 = inlined_call_operand.hbm [shape: bf16[32,96], index: 1, kind: input, shape index: {}]   ;;  %s2386_s2 = inlined_call_operand.hbm [shape: bf16[32,32], index: 2, kind: input, shape index: {}]   ;;  %s2387_s3 = inlined_call_operand.vmem [shape: f32[1,32], index: 3, kind: input, shape index: {}]   ;;  %s2388_s4 = inlined_call_operand.hbm [shape: f32[2,8,32], index: 4, kind: output, shape index: {}]  }
   0x1   :  { %11 = vsyncpa [#allocation4 + $0x1], 0 }
   0x2   :  { %12 = vsyncpa [#allocation7], 0 }
   0x3   :  { %13 = vsyncpa [#allocation5], 0 }
   0x4   :  { %15 = vsyncpa [#allocation5 + $0x1], 0  ;;  %s1985_s15 = smov 0   ;;  %s1987_s16 = smov 0  }
   0x5   :  { %s1989_s17 = smov 0   ;;  %s1991_s18 = smov 0  }
   0x6 LB: > { %s2006_s19 = sadd.s32 4294967295, %s1920_s18   ;;  %s1424_s20 = sadd.s32 4294967294, %s1920_s18   ;;  %s1920_s18 = sphi %s1991_s18, %s2408_s18   ;;  %s1916_s17 = sphi %s1989_s17, %s2407_s17   ;;  %s1912_s16 = sphi %s1987_s16, %s2406_s16   ;;  %s1908_s15 = sphi %s1985_s15, %s2405_s15  }
   0x7   : > { %p41_p0 = scmp.ne.s32.totalorder %s1912_s16, %s1908_s15  ;;  %p2389_p1 = scmp.eq.s32.totalorder %s2006_s19, 0 }
   0x8   : > { %p134_p3 = scmp.eq.s32.totalorder %s1424_s20, 1  ;;  %p1425_p5 = scmp.ge.s32.totalorder %s1920_s18, 1 }
   0x9   : > { %p2015_p4 = por %p2389_p1, %p41_p0  ;;  %p141_p7 = scmp.lt.s32.totalorder %s1920_s18, 3 }
   0xa   : > { %p2020_p6 = por %p134_p3, %p41_p0  ;;  %s1922_s24 = smov [#allocation6]  }
   0xb   : > { %s2392_s21 = scalar_select %p2015_p4, 1, 0 }
   0xc   : > { %s2393_s22 = scalar_select %p2020_p6, 1, 0 }
   0xd   : > { %p2025_p8 = pnand %p1425_p5, %p141_p7  ;;  %s153_s25 = sshll.u32 %s1922_s24, 4  ;;  %s2029_s25 = int_to_ptr.vmem [resolvable:$true] %s153_s25 }
   0xe   : > { %s1923_s27 = smov [#allocation8]   ;;  %s1764_s5 = scalar_lea.hbm %s2385_s1, 256 }
   0xf   : > { %p1639_p9 = pneg %p2025_p8  ;;  %s166_s28 = sshll.u32 %s1923_s27, 4  ;;  %s2040_s28 = int_to_ptr.vmem [resolvable:$true] %s166_s28 }
  0x10   : > { %p1765_p12 = scmp.ne.s32.totalorder %s2385_s1, %s1764_s5  ;;  %p1771_p5 = scmp.lt.u32.totalorder %s1764_s5, %s2385_s1 }
  0x11   : > { %p2036_p11 = pnand %p1639_p9, %p2389_p1 }
  0x13   : > { %p1766_p13 = pneg %p2036_p11 }
  0x15   : > { %p1767_p0 = pnand %p1766_p13, %p1765_p12 }
  0x17   : > { %p1768_p3 = pneg %p1767_p0 }
  0x19   : > { %p1773_p7 = pnand %p1771_p5, %p1768_p3 }
  0x1b   : > { %1776 = shalt.err (!%p1773_p7)
}
  0x1c   : > { %s1777_s10 = scalar_lea.vmem %s2029_s25, 256  ;;  %p1785_p2 = scmp.lt.s32.totalorder %s2029_s25, %s2029_s25 }
  0x1d   : > { %p1778_p9 = scmp.ne.s32.totalorder %s2029_s25, %s1777_s10  ;;  %p1786_p12 = scmp.lt.s32.totalorder %s1777_s10, %s1777_s10 }
  0x1f   : > { %p1780_p10 = pnand %p1778_p9, %p1766_p13  ;;  %p1787_p0 = por %p1786_p12, %p1785_p2 }
  0x21   : > { %p1781_p1 = pneg %p1780_p10 }
  0x23   : > { %p1788_p6 = pnand %p1787_p0, %p1781_p1 }
  0x25   : > { %1791 = shalt.err (!%p1788_p6)
}
  0x26   : > { %s1924_s11 = smov 64   ;;  %s1925_s12 = smov 4  }
  0x27   : > { %1642 = dma.hbm_to_vmem [thread:$0]  (!%p2036_p11), %s2385_s1, 256, %s2029_s25, [#allocation7], %s1924_s11, %s1924_s11, %s1925_s12  }
  0x28   : > { %s1792_s27 = scalar_lea.hbm %s2386_s2, 256 }
  0x29   : > { %p1793_p2 = scmp.ne.s32.totalorder %s2386_s2, %s1792_s27  ;;  %p1799_p10 = scmp.lt.u32.totalorder %s1792_s27, %s2386_s2 }
  0x2b   : > { %p1795_p1 = pnand %p1793_p2, %p1766_p13 }
  0x2d   : > { %p1796_p6 = pneg %p1795_p1 }
  0x2f   : > { %p1801_p3 = pnand %p1799_p10, %p1796_p6 }
  0x31   : > { %1804 = shalt.err (!%p1801_p3)
}
  0x32   : > { %s1805_s25 = scalar_lea.vmem %s2040_s28, 256  ;;  %p1813_p12 = scmp.lt.s32.totalorder %s2040_s28, %s2040_s28 }
  0x33   : > { %p1806_p5 = scmp.ne.s32.totalorder %s2040_s28, %s1805_s25  ;;  %p1814_p0 = scmp.lt.s32.totalorder %s1805_s25, %s1805_s25 }
  0x35   : > { %p1808_p7 = pnand %p1806_p5, %p1766_p13  ;;  %p1815_p2 = por %p1814_p0, %p1813_p12 }
  0x37   : > { %p1809_p9 = pneg %p1808_p7 }
  0x39   : > { %p1816_p1 = pnand %p1815_p2, %p1809_p9 }
  0x3b   : > { %1819 = shalt.err (!%p1816_p1)
}
  0x3c   : > { %1645 = dma.hbm_to_vmem [thread:$0]  (!%p2036_p11), %s2386_s2, 256, %s2040_s28, [#allocation7], %s1924_s11, %s1924_s11, %s1925_s12  }
  0x3d   : > { %s2095_s9 = sadd.s32 1, %s1920_s18   ;;  %s28_s26 = sadd.s32 1, %s1916_s17 }
  0x3e   : > { %s25_s10 = ssub.s32 %s1920_s18, %s2095_s9  ;;  %p35_p13 = scmp.ne.s32.totalorder %s1916_s17, %s1912_s16 }
  0x3f   : > { %p26_p6 = scmp.eq.s32.totalorder %s25_s10, 0  ;;  %p36_p10 = scmp.eq.s32.totalorder %s1920_s18, 0 }
  0x40   : > { %p2396_p3 = scmp.eq.s32.totalorder %s2006_s19, 1  ;;  %p1656_p7 = scmp.lt.s32.totalorder %s1920_s18, 2 }
  0x41   : > { %s2111_s14 = scalar_select %p26_p6, %s1916_s17, %s28_s26  }
  0x42   : > { %p2105_p5 = por %p2396_p3, %p35_p13  ;;  %p37_p9 = por %p36_p10, %p35_p13 }
  0x43   : > { %s183_s20 = sand.u32 1, %s1916_s17   ;;  %s1430_s28 = sshll.u32 %s1920_s18, 6 }
  0x44   : > { %s2397_s13 = scalar_select %p2105_p5, 1, 0 }
  0x45   : > { %s1429_s24 = sshll.u32 %s183_s20, 2  ;;  %s2118_s27 = scalar_lea.hbm %s2384_s0, %s1430_s28 }
  0x46   : > { %s187_s29 = scalar_lea.vmem [#allocation3], %s1429_s24  ;;  %p2122_p11 = pnand %p1656_p7, %p37_p9 }
  0x47   : > { %s194_s30 = sshll.u32 %s187_s29, 4  ;;  %s184_s6 = scalar_lea.sflag [#allocation4], %s183_s20  ;;  %s2120_s30 = int_to_ptr.vmem [resolvable:$true] %s194_s30 }
  0x48   : > { %s1820_s25 = scalar_lea.hbm %s2118_s27, 64  ;;  %p1822_p0 = pneg %p2122_p11 }
  0x49   : > { %p1821_p12 = scmp.ne.s32.totalorder %s2118_s27, %s1820_s25  ;;  %s1825_s26 = scalar_lea.hbm %s2384_s0, 128 }
  0x4a   : > { %p1826_p13 = scmp.lt.u32.totalorder %s2118_s27, %s2384_s0  ;;  %p1827_p6 = scmp.lt.u32.totalorder %s1825_s26, %s1820_s25 }
  0x4b   : > { %p1823_p2 = pnand %p1822_p0, %p1821_p12  ;;  %p1829_p3 = scmp.lt.u32.totalorder %s1820_s25, %s2118_s27 }
  0x4c   : > { %p1828_p10 = por %p1827_p6, %p1826_p13 }
  0x4d   : > { %p1824_p1 = pneg %p1823_p2 }
  0x4e   : > { %p1830_p7 = por %p1829_p3, %p1828_p10 }
  0x50   : > { %p1831_p9 = pnand %p1830_p7, %p1824_p1 }
  0x52   : > { %1834 = shalt.err (!%p1831_p9)
}
  0x53   : > { %s1835_s20 = scalar_lea.vmem %s2120_s30, 64  ;;  %s1926_s28 = smov [#allocation3]  }
  0x54   : > { %p1836_p12 = scmp.ne.s32.totalorder %s2120_s30, %s1835_s20  ;;  %s1840_s11 = sshll.u32 %s1926_s28, 4  ;;  %s1841_s11 = int_to_ptr.vmem [resolvable:$false] %s1840_s11 }
  0x55   : > { %s1842_s12 = scalar_lea.vmem %s1841_s11, 128  ;;  %p1843_p4 = scmp.lt.s32.totalorder %s2120_s30, %s1841_s11 }
  0x56   : > { %p1838_p2 = pnand %p1836_p12, %p1822_p0  ;;  %p1844_p13 = scmp.lt.s32.totalorder %s1842_s12, %s1835_s20 }
  0x58   : > { %p1839_p5 = pneg %p1838_p2  ;;  %p1845_p6 = por %p1844_p13, %p1843_p4 }
  0x5a   : > { %p1846_p10 = pnand %p1845_p6, %p1839_p5 }
  0x5c   : > { %1849 = shalt.err (!%p1846_p10)
}
  0x5d   : > { %1649 = dma.hbm_to_vmem [thread:$0]  (!%p2122_p11), %s2118_s27, 64, %s2120_s30, %s184_s6  }
  0x5e   : > { %203 = sbr.rel (%p2025_p8) target bundleno = 1476 (0x5c4), region = 36  ;;  %s2154_s29 = sand.u32 (!%p2025_p8), 1, %s1912_s16  }
  0x5f   : > { %s1432_s25 = sshll.u32 (!%p2025_p8), %s2154_s29, 2  ;;  %s206_s7 = scalar_lea.sflag (!%p2025_p8), [#allocation4], %s2154_s29 }
  0x60   : > { %s209_s8 = scalar_lea.vmem (!%p2025_p8), [#allocation3], %s1432_s25  ;;  %p2399_p4 = scmp.ne.s32.totalorder (!%p2025_p8), %s2392_s21, 0 }
  0x65   : > { %1895 = dma.done.wait (%p2399_p4), %s206_s7, 64  }
  0x66   : > { %1897 = vsyncadd (%p2399_p4), %s206_s7, 4294967232  ;;  %p2400_p5 = scmp.eq.s32.totalorder %s2006_s19, 0 }
  0x68   : > { %1899 = dma.done.wait (%p2400_p5), [#allocation7], 512   ;;  %p2401_p11 = pmov %p2400_p5 }
  0x69   : > { %v1927_v0 = vmov 0.0   ;;  %vm1928_vm0 = vmmov 0   ;;  %v1728_v1 = vld [vmem:[#allocation6] sm:$0xff]   ;;  %v1729_v2 = vld [vmem:[#allocation6 + $0x8] sm:$0xff]   ;;  %v243_v3 = vld [vmem:[%s209_s8] sm:$0xf] }
  0x6a   : > { %1901 = vsyncadd (%p2401_p11), [#allocation7], 4294966784  ;;  %1515 = vmatprep.subr.bf16.mxu0 %v1927_v0  ;;  %1519 = vmatprep.mubr.msk.bf16.mxu0 %vm1928_vm0, %v1927_v0  ;;  %vm260_vm1 = vcmask 261120   ;;  %s1929_s21 = smov 124   ;;  %s1930_s23 = smov 96   ;;  %vm308_vm2 = vcmask 31744  }
  0x6b   : > { %1523 = vmatprep.subr.bf16.mxu1 %v1927_v0  ;;  %1525 = vmatprep.mubr.msk.bf16.mxu1 %vm1928_vm0, %v1927_v0  ;;  %s1931_s27 = smov 88   ;;  %s1932_s30 = smov 92   ;;  %vm371_vm3 = vcmask 1043456   ;;  %vm355_vm4 = vcmask 64512   ;;  %vm418_vm5 = vcmask 27648   ;;  %vm537_vm6 = vcmask 60448  }
  0x6c   : > { %1516 = vmatpush3.bf16.msra.mxu0 %v1728_v1  ;;  %s1933_s5 = smov 84   ;;  %s1934_s6 = smov 120   ;;  %vm656_vm7 = vcmask 93248   ;;  %vm775_vm8 = vcmask 126048   ;;  %vm894_vm9 = vcmask 158848   ;;  %vm1013_vm10 = vcmask 191648  }
  0x6d   : > { %1517 = vmatprep.subr.bf16.mxu0 %v1927_v0  ;;  %s1935_s26 = smov 80   ;;  %s1936_s10 = smov 116   ;;  %vm1132_vm11 = vcmask 224448   ;;  %vm1251_vm12 = vcmask 257248  }
  0x6e   : > { %s1937_s24 = smov 76   ;;  %s1938_s20 = smov 112  }
  0x6f   : > { %s1939_s28 = smov 72   ;;  %s1940_s11 = smov 108  }
  0x70   : > { %1518 = vmatpush3.bf16.msra.mxu0 %v1729_v2  ;;  %s1941_s12 = smov 68   ;;  %s1942_s25 = smov 104  }
  0x71   : > { %1529 = vmatprep.subr.bf16.mxu0 %v1927_v0  ;;  %s1943_s7 = smov 60   ;;  %s1944_s8 = smov 100  }
  0x72   : > { %p2402_p0 = scmp.ne.s32.totalorder %s2397_s13, 0 }
  0x73   : > { %1520 = vmatmul.mubr.msk.bf16.vlgmr.msra.gmra.mrb[0].mxu0 %vm260_vm1, %v243_v3 }
  0x74   : > { %1531 = vmatprep.mubr.msk.bf16.mxu0 %vm1928_vm0, %v1927_v0 }
 0x146   : > { %v298_v4 = vpop.f32.mrb[0].mxu0 }
 0x147   : > { %v2177_v5 = vpack.c.bf16 %v298_v4, %v298_v4  ;;  %v1521_v6 = vpop.f32.mrb[1].mxu0 }
 0x148   : > { %v301_v7 = vpop.f32.mrb[2].mxu0 }
 0x149   : > { %420 = vrot.lane.b32.xlu1 %v2177_v5, %s1929_s21  ;;  %306 = vrot.lane.b32.xlu0 %v2177_v5, %s1930_s23  ;;  %v1522_v8 = vpop.f32.mrb[3].mxu0  ;;  %s1945_s21 = smov 64   ;;  %s1946_s23 = smov 56  }
 0x14d   : > { %541 = vrot.lane.b32.xlu1 %v2177_v5, %s1931_s27  ;;  %422 = vrot.lane.b32.xlu0 %v2177_v5, %s1932_s30  ;;  %s1947_s27 = smov 52   ;;  %s1948_s30 = smov 48  }
 0x151   : > { %660 = vrot.lane.b32.xlu1 %v2177_v5, %s1933_s5  ;;  %539 = vrot.lane.b32.xlu0 %v2177_v5, %s1934_s6  ;;  %s1949_s5 = smov 44   ;;  %s1950_s6 = smov 40  }
 0x155   : > { %779 = vrot.lane.b32.xlu1 %v2177_v5, %s1935_s26  ;;  %658 = vrot.lane.b32.xlu0 %v2177_v5, %s1936_s10  ;;  %s1951_s26 = smov 36   ;;  %s1952_s10 = smov 4  }
 0x159   : > { %898 = vrot.lane.b32.xlu1 %v2177_v5, %s1937_s24  ;;  %777 = vrot.lane.b32.xlu0 %v2177_v5, %s1938_s20  ;;  %s1953_s24 = smov 8   ;;  %s1954_s20 = smov 12  }
 0x15d   : > { %1017 = vrot.lane.b32.xlu1 %v2177_v5, %s1939_s28  ;;  %896 = vrot.lane.b32.xlu0 %v2177_v5, %s1940_s11  ;;  %s1955_s28 = smov 16   ;;  %s1956_s11 = smov 20  }
 0x161   : > { %1136 = vrot.lane.b32.xlu1 %v2177_v5, %s1941_s12  ;;  %1015 = vrot.lane.b32.xlu0 %v2177_v5, %s1942_s25  ;;  %s1957_s12 = smov 24   ;;  %s1958_s25 = smov 28  }
 0x165   : > { %480 = vrot.lane.b32.xlu1 %v2177_v5, %s1943_s7  ;;  %1134 = vrot.lane.b32.xlu0 %v2177_v5, %s1944_s8  ;;  %s1435_s7 = sshll.u32 %s2154_s29, 3 }
 0x169   : > { %366 = vrot.lane.b32.xlu0 %v2177_v5, %s1945_s21 }
 0x1bb   : > { %v307_v9 = vpop.permute.xlu0 %306  ;;  %v421_v12 = vpop.permute.xlu1 %420 }
 0x1bc   : > { %v313_v10 = vsel %vm308_vm2, %v307_v9, 0 }
 0x1bd   : > { %1524 = vmatpush3.bf16.xpose.msra.mxu1 %v313_v10 }
 0x1be   : > { %1535 = vmatprep.subr.bf16.mxu1 %v1927_v0 }
 0x1bf   : > { %v423_v11 = vpop.permute.xlu0 %422  ;;  %v542_v16 = vpop.permute.xlu1 %541 }
 0x1c0   : > { %v428_v14 = vsel %vm308_vm2, %v423_v11, 0  ;;  %v547_v18 = vsel %vm308_vm2, %v542_v16, 0 }
 0x1c3   : > { %v540_v13 = vpop.permute.xlu0 %539  ;;  %v661_v20 = vpop.permute.xlu1 %660 }
 0x1c4   : > { %1526 = vmatmul.mubr.msk.bf16.vlgmr.msra.gmra.mrb[0].mxu1 %vm308_vm2, %v2177_v5  ;;  %v666_v22 = vsel %vm308_vm2, %v661_v20, 0 }
 0x1c5   : > { %1536 = vmatpush3.bf16.xpose.msra.mxu1 %v428_v14  ;;  %1537 = vmatprep.mubr.msk.bf16.mxu1 %vm1928_vm0, %v1927_v0 }
 0x1c6   : > { %1547 = vmatprep.subr.bf16.mxu1 %v1927_v0 }
 0x1c7   : > { %v659_v15 = vpop.permute.xlu0 %658  ;;  %v780_v24 = vpop.permute.xlu1 %779 }
 0x1c8   : > { %v785_v26 = vsel %vm308_vm2, %v780_v24, 0 }
 0x1cb   : > { %v778_v17 = vpop.permute.xlu0 %777  ;;  %v899_v28 = vpop.permute.xlu1 %898 }
 0x1cc   : > { %1538 = vmatmul.mubr.msk.bf16.vlgmr.msra.gmra.mrb[4].mxu1 %vm308_vm2, %v421_v12  ;;  %v904_v29 = vsel %vm308_vm2, %v899_v28, 0 }
 0x1cd   : > { %1548 = vmatpush3.bf16.xpose.msra.mxu1 %v547_v18  ;;  %1549 = vmatprep.mubr.msk.bf16.mxu1 %vm1928_vm0, %v1927_v0 }
 0x1ce   : > { %1559 = vmatprep.subr.bf16.mxu1 %v1927_v0 }
 0x1cf   : > { %v897_v19 = vpop.permute.xlu0 %896  ;;  %v1018_v30 = vpop.permute.xlu1 %1017 }
 0x1d0   : > { %v1023_v31 = vsel %vm308_vm2, %v1018_v30, 0 }
 0x1d3   : > { %v1016_v21 = vpop.permute.xlu0 %1015  ;;  %v1137_v32 = vpop.permute.xlu1 %1136 }
 0x1d4   : > { %1550 = vmatmul.mubr.msk.bf16.vlgmr.msra.gmra.mrb[8].mxu1 %vm308_vm2, %v540_v13  ;;  %v1142_v33 = vsel %vm308_vm2, %v1137_v32, 0 }
 0x1d5   : > { %1560 = vmatpush3.bf16.xpose.msra.mxu1 %v666_v22  ;;  %1561 = vmatprep.mubr.msk.bf16.mxu1 %vm1928_vm0, %v1927_v0 }
 0x1d6   : > { %1571 = vmatprep.subr.bf16.mxu1 %v1927_v0 }
 0x1d7   : > { %v1135_v23 = vpop.permute.xlu0 %1134  ;;  %v481_v12 = vpop.permute.xlu1 %480 }
 0x1db   : > { %v367_v25 = vpop.permute.xlu0 %366 }
 0x1dc   : > { %v373_v27 = vsel %vm371_vm3, %v367_v25, 0  ;;  %1562 = vmatmul.mubr.msk.bf16.vlgmr.msra.gmra.mrb[12].mxu1 %vm308_vm2, %v659_v15 }
 0x1dd   : > { %1530 = vmatpush3.bf16.msra.mxu0 %v373_v27  ;;  %1572 = vmatpush3.bf16.xpose.msra.mxu1 %v785_v26 }
 0x1de   : > { %1573 = vmatprep.mubr.msk.bf16.mxu1 %vm1928_vm0, %v1927_v0  ;;  %1583 = vmatprep.subr.bf16.mxu1 %v1927_v0 }
 0x1df   : > { %1541 = vmatprep.subr.bf16.mxu0 %v1927_v0 }
 0x1e4   : > { %1574 = vmatmul.mubr.msk.bf16.vlgmr.msra.gmra.mrb[16].mxu1 %vm308_vm2, %v778_v17 }
 0x1e5   : > { %1584 = vmatpush3.bf16.xpose.msra.mxu1 %v904_v29  ;;  %1585 = vmatprep.mubr.msk.bf16.mxu1 %vm1928_vm0, %v1927_v0 }
 0x1e6   : > { %1595 = vmatprep.subr.bf16.mxu1 %v1927_v0 }
 0x1ec   : > { %1586 = vmatmul.mubr.msk.bf16.vlgmr.msra.gmra.mrb[20].mxu1 %vm308_vm2, %v897_v19 }
 0x1ed   : > { %1596 = vmatpush3.bf16.xpose.msra.mxu1 %v1023_v31  ;;  %1597 = vmatprep.mubr.msk.bf16.mxu1 %vm1928_vm0, %v1927_v0 }
 0x1ee   : > { %1607 = vmatprep.subr.bf16.mxu1 %v1927_v0 }
 0x1f4   : > { %1598 = vmatmul.mubr.msk.bf16.vlgmr.msra.gmra.mrb[24].mxu1 %vm308_vm2, %v1016_v21 }
 0x1f5   : > { %1608 = vmatpush3.bf16.xpose.msra.mxu1 %v1142_v33  ;;  %1609 = vmatprep.mubr.msk.bf16.mxu1 %vm1928_vm0, %v1927_v0 }
 0x1f6   : > { %1619 = vmatprep.subr.bf16.mxu1 %v1927_v0 }
 0x1fc   : > { %1610 = vmatmul.mubr.msk.bf16.vlgmr.msra.gmra.mrb[28].mxu1 %vm308_vm2, %v1135_v23 }
 0x1fd   : > { %1623 = vmatprep.mubr.msk.bf16.mxu1 %vm1928_vm0, %v1927_v0 }
 0x297   : > { %v2239_v34 = vpop.f32.mrb[0].mxu1 }
 0x298   : > { %v1527_v35 = vpop.f32.mrb[1].mxu1  ;;  %v356_v36 = vsel %vm355_vm4, %v2239_v34, -inf }
 0x299   : > { %357 = vmax.xlane.f32.xlu1 %v356_v36  ;;  %v352_v37 = vpop.f32.mrb[2].mxu1 }
 0x29a   : > { %v1528_v38 = vpop.f32.mrb[3].mxu1 }
 0x29f   : > { %v464_v39 = vpop.f32.mrb[4].mxu1 }
 0x2a0   : > { %v1539_v40 = vpop.f32.mrb[5].mxu1  ;;  %v470_v41 = vsel %vm355_vm4, %v464_v39, -inf }
 0x2a1   : > { %471 = vmax.xlane.f32.xlu0 %v470_v41  ;;  %v467_v42 = vpop.f32.mrb[6].mxu1 }
 0x2a2   : > { %v1540_v43 = vpop.f32.mrb[7].mxu1 }
 0x2a7   : > { %v2244_v44 = vpop.f32.mrb[8].mxu1 }
 0x2a8   : > { %v1551_v45 = vpop.f32.mrb[9].mxu1  ;;  %v589_v46 = vsel %vm355_vm4, %v2244_v44, -inf }
 0x2a9   : > { %590 = vmax.xlane.f32.xlu0 %v589_v46  ;;  %v586_v47 = vpop.f32.mrb[10].mxu1 }
 0x2aa   : > { %599 = vrot.lane.b32.xlu1 %v2177_v5, %s1946_s23  ;;  %v1552_v48 = vpop.f32.mrb[11].mxu1  ;;  %s1467_s23 = sshll.u32 %s2006_s19, 7  ;;  %s1322_s19 = scalar_lea.sflag [#allocation5], %s2154_s29 }
 0x2af   : > { %v2249_v49 = vpop.f32.mrb[12].mxu1 }
 0x2b0   : > { %v1563_v50 = vpop.f32.mrb[13].mxu1  ;;  %v708_v2 = vsel %vm355_vm4, %v2249_v49, -inf }
 0x2b1   : > { %v705_v51 = vpop.f32.mrb[14].mxu1 }
 0x2b2   : > { %v1564_v52 = vpop.f32.mrb[15].mxu1 }
 0x2b7   : > { %v2251_v53 = vpop.f32.mrb[16].mxu1 }
 0x2b8   : > { %v1575_v54 = vpop.f32.mrb[17].mxu1  ;;  %v827_v7 = vsel %vm355_vm4, %v2251_v53, -inf }
 0x2b9   : > { %v824_v55 = vpop.f32.mrb[18].mxu1 }
 0x2ba   : > { %v1576_v56 = vpop.f32.mrb[19].mxu1 }
 0x2bf   : > { %718 = vrot.lane.b32.xlu0 %v2177_v5, %s1947_s27  ;;  %v2254_v57 = vpop.f32.mrb[20].mxu1  ;;  %s241_s27 = scalar_lea.vmem [#allocation9], %s1435_s7 }
 0x2c0   : > { %v1587_v58 = vpop.f32.mrb[21].mxu1  ;;  %v946_v11 = vsel %vm355_vm4, %v2254_v57, -inf }
 0x2c1   : > { %v943_v59 = vpop.f32.mrb[22].mxu1 }
 0x2c2   : > { %v1588_v60 = vpop.f32.mrb[23].mxu1 }
 0x2c7   : > { %v2256_v61 = vpop.f32.mrb[24].mxu1 }
 0x2c8   : > { %v1599_v62 = vpop.f32.mrb[25].mxu1  ;;  %v1065_v9 = vsel %vm355_vm4, %v2256_v61, -inf }
 0x2c9   : > { %v1062_v63 = vpop.f32.mrb[26].mxu1 }
 0x2ca   : > { %v1600_v1 = vpop.f32.mrb[27].mxu1 }
 0x2ce   : > { %709 = vmax.xlane.f32.xlu1 %v708_v2 }
 0x2cf   : > { %v2260_v3 = vpop.f32.mrb[28].mxu1 }
 0x2d0   : > { %v1611_v4 = vpop.f32.mrb[29].mxu1  ;;  %v1184_v10 = vsel %vm355_vm4, %v2260_v3, -inf }
 0x2d1   : > { %v1181_v6 = vpop.f32.mrb[30].mxu1 }
 0x2d2   : > { %828 = vmax.xlane.f32.xlu1 %v827_v7  ;;  %v1612_v8 = vpop.f32.mrb[31].mxu1 }
 0x2d6   : > { %1066 = vmax.xlane.f32.xlu1 %v1065_v9 }
 0x2da   : > { %1185 = vmax.xlane.f32.xlu1 %v1184_v10 }
 0x2de   : > { %947 = vmax.xlane.f32.xlu0 %v946_v11 }
 0x2eb   : > { %837 = vrot.lane.b32.xlu1 %v2177_v5, %s1948_s30  ;;  %s1335_s30 = sshll.u32 %s241_s27, 4  ;;  %s2341_s30 = int_to_ptr.vmem [resolvable:$true] %s1335_s30 }
 0x2f4   : > { %956 = vrot.lane.b32.xlu0 %v2177_v5, %s1949_s5 }
 0x2f8   : > { %1075 = vrot.lane.b32.xlu0 %v2177_v5, %s1950_s6 }
 0x2fc   : > { %1194 = vrot.lane.b32.xlu0 %v2177_v5, %s1951_s26  ;;  %v486_v5 = vsel %vm371_vm3, %v481_v12, 0  ;;  %s2339_s26 = scalar_lea.hbm %s2388_s4, %s1467_s23 }
 0x326   : > { %v358_v13 = vpop.xlane.xlu1 %357 }
 0x327   : > { %v359_v14 = vsub.f32 %v2239_v34, %v358_v13 }
 0x329   : > { %v360_v15 = vmul.f32 1.442695, %v359_v14 }
 0x32a   : > { %v600_v25 = vpop.permute.xlu1 %599 }
 0x32b   : > { %1732 = vpow2.f32 %v360_v15  ;;  %v605_v28 = vsel %vm371_vm3, %v600_v25, 0 }
 0x32e   : > { %v472_v16 = vpop.xlane.xlu0 %471 }
 0x32f   : > { %v473_v17 = vsub.f32 %v464_v39, %v472_v16 }
 0x331   : > { %v474_v18 = vmul.f32 1.442695, %v473_v17 }
 0x333   : > { %1734 = vpow2.f32 %v474_v18 }
 0x335   : > { %v2275_v19 = vpop.eup %1732 }
 0x336   : > { %v591_v20 = vpop.xlane.xlu0 %590  ;;  %v365_v21 = vpack.c.bf16 %v2275_v19, %v2275_v19 }
 0x337   : > { %v592_v22 = vsub.f32 %v2244_v44, %v591_v20 }
 0x338   : > { %1532 = vmatmul.mubr.msk.bf16.vlgmr.msra.gmra.mrb[4].mxu0 %vm355_vm4, %v365_v21 }
 0x339   : > { %v593_v23 = vmul.f32 1.442695, %v592_v22  ;;  %1542 = vmatpush3.bf16.msra.mxu0 %v486_v5  ;;  %1543 = vmatprep.mubr.msk.bf16.mxu0 %vm1928_vm0, %v1927_v0 }
 0x33a   : > { %1553 = vmatprep.subr.bf16.mxu0 %v1927_v0  ;;  %v719_v30 = vpop.permute.xlu0 %718 }
 0x33b   : > { %1736 = vpow2.f32 %v593_v23  ;;  %v724_v33 = vsel %vm371_vm3, %v719_v30, 0 }
 0x33d   : > { %v1735_v24 = vpop.eup %1734 }
 0x33e   : > { %v476_v26 = vsel %vm355_vm4, %v1735_v24, 0.0  ;;  %v479_v27 = vpack.c.bf16 %v1735_v24, %v1735_v24 }
 0x33f   : > { %477 = vadd.xlane.f32.xlu1 %v476_v26 }
 0x340   : > { %1544 = vmatmul.mubr.msk.bf16.vlgmr.msra.gmra.mrb[8].mxu0 %vm355_vm4, %v479_v27 }
 0x341   : > { %1554 = vmatpush3.bf16.msra.mxu0 %v605_v28  ;;  %1555 = vmatprep.mubr.msk.bf16.mxu0 %vm1928_vm0, %v1927_v0 }
 0x342   : > { %1565 = vmatprep.subr.bf16.mxu0 %v1927_v0 }
 0x345   : > { %v1737_v29 = vpop.eup %1736 }
 0x346   : > { %v595_v31 = vsel %vm355_vm4, %v1737_v29, 0.0  ;;  %v598_v32 = vpack.c.bf16 %v1737_v29, %v1737_v29 }
 0x347   : > { %596 = vadd.xlane.f32.xlu0 %v595_v31 }
 0x348   : > { %1556 = vmatmul.mubr.msk.bf16.vlgmr.msra.gmra.mrb[12].mxu0 %vm355_vm4, %v598_v32 }
 0x349   : > { %1566 = vmatpush3.bf16.msra.mxu0 %v724_v33  ;;  %1567 = vmatprep.mubr.msk.bf16.mxu0 %vm1928_vm0, %v1927_v0 }
 0x34a   : > { %1577 = vmatprep.subr.bf16.mxu0 %v1927_v0 }
 0x35b   : > { %v710_v34 = vpop.xlane.xlu1 %709 }
 0x35c   : > { %v711_v35 = vsub.f32 %v2249_v49, %v710_v34 }
 0x35e   : > { %v712_v36 = vmul.f32 1.442695, %v711_v35 }
 0x35f   : > { %v829_v37 = vpop.xlane.xlu1 %828 }
 0x360   : > { %1738 = vpow2.f32 %v712_v36  ;;  %v830_v38 = vsub.f32 %v2251_v53, %v829_v37 }
 0x362   : > { %v831_v39 = vmul.f32 1.442695, %v830_v38 }
 0x363   : > { %v1067_v40 = vpop.xlane.xlu1 %1066 }
 0x364   : > { %1740 = vpow2.f32 %v831_v39  ;;  %v1068_v41 = vsub.f32 %v2256_v61, %v1067_v40  ;;  %v362_v61 = vsel %vm355_vm4, %v2275_v19, 0.0 }
 0x366   : > { %v1069_v42 = vmul.f32 1.442695, %v1068_v41 }
 0x367   : > { %v1186_v43 = vpop.xlane.xlu1 %1185 }
 0x368   : > { %1742 = vpow2.f32 %v1069_v42  ;;  %v1187_v45 = vsub.f32 %v2260_v3, %v1186_v43 }
 0x36a   : > { %v1739_v44 = vpop.eup %1738  ;;  %v1188_v53 = vmul.f32 1.442695, %v1187_v45 }
 0x36b   : > { %v838_v46 = vpop.permute.xlu1 %837  ;;  %v948_v47 = vpop.xlane.xlu0 %947  ;;  %v714_v48 = vsel %vm355_vm4, %v1739_v44, 0.0  ;;  %v717_v49 = vpack.c.bf16 %v1739_v44, %v1739_v44 }
 0x36c   : > { %v843_v50 = vsel %vm371_vm3, %v838_v46, 0  ;;  %v949_v51 = vsub.f32 %v2254_v57, %v948_v47  ;;  %715 = vadd.xlane.f32.xlu0 %v714_v48 }
 0x36d   : > { %1568 = vmatmul.mubr.msk.bf16.vlgmr.msra.gmra.mrb[16].mxu0 %vm355_vm4, %v717_v49 }
 0x36e   : > { %v1741_v52 = vpop.eup %1740  ;;  %v950_v54 = vmul.f32 1.442695, %v949_v51  ;;  %1578 = vmatpush3.bf16.msra.mxu0 %v843_v50  ;;  %1579 = vmatprep.mubr.msk.bf16.mxu0 %vm1928_vm0, %v1927_v0 }
 0x36f   : > { %v833_v55 = vsel %vm355_vm4, %v1741_v52, 0.0  ;;  %1589 = vmatprep.subr.bf16.mxu0 %v1927_v0  ;;  %v957_v58 = vpop.permute.xlu0 %956  ;;  %v836_v59 = vpack.c.bf16 %v1741_v52, %v1741_v52 }
 0x370   : > { %1744 = vpow2.f32 %v950_v54  ;;  %834 = vadd.xlane.f32.xlu1 %v833_v55  ;;  %v962_v60 = vsel %vm371_vm3, %v957_v58, 0 }
 0x371   : > { %1746 = vpow2.f32 %v1188_v53 }
 0x372   : > { %v1743_v56 = vpop.eup %1742 }
 0x373   : > { %v1071_v57 = vsel %vm355_vm4, %v1743_v56, 0.0  ;;  %v1076_v63 = vpop.permute.xlu0 %1075  ;;  %v1074_v8 = vpack.c.bf16 %v1743_v56, %v1743_v56 }
 0x374   : > { %1072 = vadd.xlane.f32.xlu1 %v1071_v57  ;;  %v1081_v4 = vsel %vm371_vm3, %v1076_v63, 0 }
 0x375   : > { %1580 = vmatmul.mubr.msk.bf16.vlgmr.msra.gmra.mrb[20].mxu0 %vm355_vm4, %v836_v59 }
 0x376   : > { %1590 = vmatpush3.bf16.msra.mxu0 %v962_v60  ;;  %1591 = vmatprep.mubr.msk.bf16.mxu0 %vm1928_vm0, %v1927_v0 }
 0x377   : > { %1601 = vmatprep.subr.bf16.mxu0 %v1927_v0  ;;  %v1195_v7 = vpop.permute.xlu0 %1194 }
 0x378   : > { %363 = vadd.xlane.f32.xlu1 %v362_v61  ;;  %v1200_v9 = vsel %vm371_vm3, %v1195_v7, 0 }
 0x37a   : > { %v1745_v62 = vpop.eup %1744 }
 0x37b   : > { %v952_v1 = vsel %vm355_vm4, %v1745_v62, 0.0  ;;  %v955_v2 = vpack.c.bf16 %v1745_v62, %v1745_v62  ;;  %v1747_v3 = vpop.eup %1746  ;;  %v1730_v62 = vld [vmem:[#allocation8] sm:$0xff]  }
 0x37c   : > { %953 = vadd.xlane.f32.xlu0 %v952_v1  ;;  %v1190_v6 = vsel %vm355_vm4, %v1747_v3, 0.0  ;;  %v1193_v10 = vpack.c.bf16 %v1747_v3, %v1747_v3  ;;  %1620 = vmatpush3.bf16.msra.mxu1 %v1730_v62  ;;  %v1731_v3 = vld [vmem:[#allocation8 + $0x8] sm:$0xff]  }
 0x37d   : > { %1592 = vmatmul.mubr.msk.bf16.vlgmr.msra.gmra.mrb[24].mxu0 %vm355_vm4, %v955_v2  ;;  %1621 = vmatprep.subr.bf16.mxu1 %v1927_v0 }
 0x37e   : > { %1602 = vmatpush3.bf16.msra.mxu0 %v1081_v4  ;;  %1603 = vmatprep.mubr.msk.bf16.mxu0 %vm1928_vm0, %v1927_v0 }
 0x37f   : > { %1613 = vmatprep.subr.bf16.mxu0 %v1927_v0 }
 0x380   : > { %1191 = vadd.xlane.f32.xlu0 %v1190_v6  ;;  %1622 = vmatpush3.bf16.msra.mxu1 %v1731_v3 }
 0x385   : > { %1604 = vmatmul.mubr.msk.bf16.vlgmr.msra.gmra.mrb[28].mxu0 %vm355_vm4, %v1074_v8 }
 0x386   : > { %1614 = vmatpush3.bf16.msra.mxu0 %v1200_v9  ;;  %1615 = vmatprep.mubr.msk.bf16.mxu0 %vm1928_vm0, %v1927_v0 }
 0x38d   : > { %1616 = vmatmul.mubr.msk.bf16.vlgmr.msra.gmra.mrb[32].mxu0 %vm355_vm4, %v1193_v10 }
 0x3cc   : > { %v478_v11 = vpop.xlane.xlu1 %477 }
 0x3d4   : > { %v597_v18 = vpop.xlane.xlu0 %596 }
 0x3f9   : > { %v716_v36 = vpop.xlane.xlu0 %715 }
 0x3fd   : > { %v835_v12 = vpop.xlane.xlu1 %834 }
 0x401   : > { %v1073_v13 = vpop.xlane.xlu1 %1072 }
 0x405   : > { %v364_v14 = vpop.xlane.xlu1 %363 }
 0x406   : > { %1748 = vrcp.f32 %v364_v14 }
 0x407   : > { %1750 = vrcp.f32 %v478_v11 }
 0x408   : > { %1752 = vrcp.f32 %v597_v18 }
 0x409   : > { %1754 = vrcp.f32 %v716_v36  ;;  %v954_v42 = vpop.xlane.xlu0 %953 }
 0x40a   : > { %1756 = vrcp.f32 %v835_v12 }
 0x40b   : > { %v409_v15 = vpop.f32.mrb[4].mxu0  ;;  %1758 = vrcp.f32 %v954_v42 }
 0x40c   : > { %v1533_v16 = vpop.f32.mrb[5].mxu0  ;;  %1760 = vrcp.f32 %v1073_v13 }
 0x40d   : > { %v412_v17 = vpop.f32.mrb[6].mxu0  ;;  %v1192_v58 = vpop.xlane.xlu0 %1191 }
 0x40e   : > { %v1534_v19 = vpop.f32.mrb[7].mxu0  ;;  %1762 = vrcp.f32 %v1192_v58 }
 0x410   : > { %v1749_v20 = vpop.eup %1748 }
 0x411   : > { %v416_v21 = vmul.f32 %v1749_v20, %v409_v15  ;;  %v1751_v22 = vpop.eup %1750 }
 0x412   : > { %v1753_v29 = vpop.eup %1752 }
 0x413   : > { %v417_v5 = vpack.c.bf16 %v416_v21, %v416_v21  ;;  %v522_v23 = vpop.f32.mrb[8].mxu0  ;;  %v1755_v37 = vpop.eup %1754  ;;  %v1462_v21 = vld [vmem:[%s2387_s3] ss:$0 sm:$0xff] }
 0x414   : > { %v529_v24 = vmul.f32 %v1751_v22, %v522_v23  ;;  %v1545_v25 = vpop.f32.mrb[9].mxu0  ;;  %v1757_v45 = vpop.eup %1756 }
 0x415   : > { %419 = vst.msk [vmem:[#allocation2] sm:$0xf] %vm418_vm5, %v417_v5  ;;  %v525_v26 = vpop.f32.mrb[10].mxu0  ;;  %v1759_v52 = vpop.eup %1758 }
 0x416   : > { %v1470_v27 = vpack.c.bf16 %v529_v24, %v529_v24  ;;  %v1546_v28 = vpop.f32.mrb[11].mxu0  ;;  %v1761_v60 = vpop.eup %1760 }
 0x418   : > { %534 = vrot.lane.b32.xlu0 %v1470_v27, %s1952_s10  ;;  %v1763_v7 = vpop.eup %1762  ;;  %s1850_s10 = scalar_lea.vmem %s2341_s30, 128 }
 0x419   : > { %p1851_p8 = scmp.ne.s32.totalorder %s2341_s30, %s1850_s10 }
 0x41b   : > { %v641_v30 = vpop.f32.mrb[12].mxu0  ;;  %p1852_p1 = pnand %p1851_p8, %p2402_p0 }
 0x41c   : > { %v648_v31 = vmul.f32 %v1753_v29, %v641_v30  ;;  %v1557_v32 = vpop.f32.mrb[13].mxu0 }
 0x41d   : > { %v644_v33 = vpop.f32.mrb[14].mxu0  ;;  %p1853_p3 = pneg %p1852_p1 }
 0x41e   : > { %v1471_v34 = vpack.c.bf16 %v648_v31, %v648_v31  ;;  %v1558_v35 = vpop.f32.mrb[15].mxu0 }
 0x420   : > { %653 = vrot.lane.b32.xlu1 %v1471_v34, %s1953_s24  ;;  %s1959_s24 = smov [#allocation9]  }
 0x440   : > { %v760_v38 = vpop.f32.mrb[16].mxu0 }
 0x441   : > { %v767_v39 = vmul.f32 %v1755_v37, %v760_v38  ;;  %v1569_v40 = vpop.f32.mrb[17].mxu0 }
 0x442   : > { %v763_v41 = vpop.f32.mrb[18].mxu0 }
 0x443   : > { %v1472_v43 = vpack.c.bf16 %v767_v39, %v767_v39  ;;  %v1570_v44 = vpop.f32.mrb[19].mxu0 }
 0x445   : > { %772 = vrot.lane.b32.xlu1 %v1472_v43, %s1954_s20  ;;  %s1854_s20 = sshll.u32 %s1959_s24, 4  ;;  %s1855_s20 = int_to_ptr.vmem [resolvable:$false] %s1854_s20 }
 0x446   : > { %p1857_p7 = scmp.lt.s32.totalorder %s2341_s30, %s1855_s20 }
 0x448   : > { %v879_v46 = vpop.f32.mrb[20].mxu0 }
 0x449   : > { %v886_v47 = vmul.f32 %v1757_v45, %v879_v46  ;;  %v1581_v48 = vpop.f32.mrb[21].mxu0 }
 0x44a   : > { %v882_v49 = vpop.f32.mrb[22].mxu0 }
 0x44b   : > { %v1473_v50 = vpack.c.bf16 %v886_v47, %v886_v47  ;;  %v1582_v51 = vpop.f32.mrb[23].mxu0 }
 0x44d   : > { %891 = vrot.lane.b32.xlu0 %v1473_v50, %s1955_s28  ;;  %s1856_s28 = scalar_lea.vmem %s1855_s20, 256 }
 0x44e   : > { %p1858_p9 = scmp.lt.s32.totalorder %s1856_s28, %s1850_s10 }
 0x450   : > { %v998_v53 = vpop.f32.mrb[24].mxu0  ;;  %p1859_p12 = por %p1858_p9, %p1857_p7 }
 0x451   : > { %v1005_v54 = vmul.f32 %v1759_v52, %v998_v53  ;;  %v1593_v55 = vpop.f32.mrb[25].mxu0 }
 0x452   : > { %v1001_v56 = vpop.f32.mrb[26].mxu0  ;;  %p1860_p2 = pnand %p1859_p12, %p1853_p3 }
 0x453   : > { %v1474_v57 = vpack.c.bf16 %v1005_v54, %v1005_v54  ;;  %v1594_v59 = vpop.f32.mrb[27].mxu0 }
 0x455   : > { %1010 = vrot.lane.b32.xlu1 %v1474_v57, %s1956_s11 }
 0x458   : > { %v1117_v61 = vpop.f32.mrb[28].mxu0 }
 0x459   : > { %v1124_v63 = vmul.f32 %v1761_v60, %v1117_v61  ;;  %v1605_v1 = vpop.f32.mrb[29].mxu0 }
 0x45a   : > { %v1120_v2 = vpop.f32.mrb[30].mxu0 }
 0x45b   : > { %v1475_v4 = vpack.c.bf16 %v1124_v63, %v1124_v63  ;;  %v1606_v6 = vpop.f32.mrb[31].mxu0 }
 0x45d   : > { %1129 = vrot.lane.b32.xlu0 %v1475_v4, %s1957_s12 }
 0x460   : > { %v1236_v8 = vpop.f32.mrb[32].mxu0 }
 0x461   : > { %v1243_v9 = vmul.f32 %v1763_v7, %v1236_v8  ;;  %v1617_v10 = vpop.f32.mrb[33].mxu0 }
 0x462   : > { %v1239_v11 = vpop.f32.mrb[34].mxu0 }
 0x463   : > { %v1476_v12 = vpack.c.bf16 %v1243_v9, %v1243_v9  ;;  %v1618_v13 = vpop.f32.mrb[35].mxu0 }
 0x465   : > { %1248 = vrot.lane.b32.xlu1 %v1476_v12, %s1958_s25 }
 0x48a   : > { %v535_v14 = vpop.permute.xlu0 %534 }
 0x48b   : > { %538 = vst.msk [vmem:[#allocation2] sm:$0xf] %vm537_vm6, %v535_v14 }
 0x492   : > { %v654_v15 = vpop.permute.xlu1 %653 }
 0x493   : > { %657 = vst.msk [vmem:[#allocation2] sm:$0xf] %vm656_vm7, %v654_v15 }
 0x4b7   : > { %v773_v0 = vpop.permute.xlu1 %772 }
 0x4b8   : > { %776 = vst.msk [vmem:[#allocation2] sm:$0xf] %vm775_vm8, %v773_v0 }
 0x4bf   : > { %v892_v16 = vpop.permute.xlu0 %891 }
 0x4c0   : > { %895 = vst.msk [vmem:[#allocation2] sm:$0xf] %vm894_vm9, %v892_v16 }
 0x4c7   : > { %v1011_v17 = vpop.permute.xlu1 %1010 }
 0x4c8   : > { %1014 = vst.msk [vmem:[#allocation2] sm:$0xf] %vm1013_vm10, %v1011_v17 }
 0x4cf   : > { %v1130_v18 = vpop.permute.xlu0 %1129 }
 0x4d0   : > { %1133 = vst.msk [vmem:[#allocation2] sm:$0xf] %vm1132_vm11, %v1130_v18 }
 0x4d7   : > { %v1249_v19 = vpop.permute.xlu1 %1248 }
 0x4d8   : > { %1252 = vst.msk [vmem:[#allocation2] sm:$0xf] %vm1251_vm12, %v1249_v19 }
 0x4df   : > { %v1253_v20 = vld [vmem:[#allocation2] sm:$0xf] }
 0x4e0   : > { %1624 = vmatmul.mubr.msk.bf16.vlgmr.msra.gmra.mrb[32].mxu1 %vm260_vm1, %v1253_v20 }
 0x5b3   : > { %v1314_v22 = vpop.f32.mrb[32].mxu1 }
 0x5b4   : > { %v1315_v5 = vadd.f32 %v1462_v21, %v1314_v22  ;;  %v1625_v23 = vpop.f32.mrb[33].mxu1 }
 0x5b5   : > { %v1317_v24 = vpop.f32.mrb[34].mxu1 }
 0x5b6   : > { %v1626_v25 = vpop.f32.mrb[35].mxu1  ;;  %1320 = vst.msk [vmem:[%s241_s27] sm:$0xff] %vm260_vm1, %v1315_v5 }
 0x5b7   : > { %1863 = shalt.err (!%p1860_p2)
}
 0x5b8   : > { %s1864_s29 = scalar_lea.hbm %s2339_s26, 128  ;;  %s1868_s25 = scalar_lea.hbm %s2388_s4, 256 }
 0x5b9   : > { %p1865_p13 = scmp.ne.s32.totalorder %s2339_s26, %s1864_s29  ;;  %p1869_p4 = scmp.lt.u32.totalorder %s2339_s26, %s2388_s4 }
 0x5ba   : > { %p1870_p5 = scmp.lt.u32.totalorder %s1868_s25, %s1864_s29  ;;  %p1872_p8 = scmp.lt.u32.totalorder %s1864_s29, %s2339_s26 }
 0x5bb   : > { %p1866_p6 = pnand %p1865_p13, %p2402_p0 }
 0x5bc   : > { %p1871_p11 = por %p1870_p5, %p1869_p4 }
 0x5bd   : > { %p1867_p10 = pneg %p1866_p6 }
 0x5be   : > { %p1873_p1 = por %p1872_p8, %p1871_p11 }
 0x5c0   : > { %p1874_p3 = pnand %p1873_p1, %p1867_p10 }
 0x5c2   : > { %1877 = shalt.err (!%p1874_p3)
}
 0x5c3   : > { %1637 = dma.vmem_to_hbm [thread:$0]  (%p2402_p0), %s2341_s30, 128, %s2339_s26, %s1322_s19  }
 0x5c4 PF: > { %s1347_s21 = sand.u32 1, %s1908_s15   ;;  %p2403_p7 = scmp.ne.s32.totalorder %s2393_s22, 0 }
 0x5c5   : > { %p2404_p9 = scmp.ge.s32.totalorder %s1920_s18, 2  ;;  %s1348_s23 = scalar_lea.sflag [#allocation5], %s1347_s21 }
 0x5c7   : > { %p1651_p12 = pnand %p2404_p9, %p2403_p7 }
 0x5c9   : > { %1903 = dma.done.wait (!%p1651_p12), %s1348_s23, 128  }
 0x5ca   : > { %1905 = vsyncadd (!%p1651_p12), %s1348_s23, 4294967168  ;;  %p18_p2 = scmp.ge.s32.totalorder %s2095_s9, 4   ;;  %s2405_s15 = smov %s1912_s16 }
 0x5cb   : > { %s2406_s16 = smov %s1916_s17  ;;  %s2407_s17 = smov %s2111_s14 }
 0x5cc   : > { %s2408_s18 = smov %s2095_s9  ;;  %20 = sbr.rel (!%p18_p2) target bundleno = 6 (0x6), region = 89 }
 0x5d3   :  { %1353 = vsyncpa [#allocation4], 1 }
 0x5d4   :  { %1355 = vsyncpa [#allocation4 + $0x1], 1 }
 0x5d5   :  { %1356 = vsyncpa [#allocation7], 1 }
 0x5d6   :  { %1357 = vsyncpa [#allocation5], 1 }
 0x5d7   :  { %1359 = vsyncpa [#allocation5 + $0x1], 1 }

</bundles_post_ra>
